<compile_context>
chip_gen: v5e
topology: v5e:2x2
jax: 0.10.0
libtpu: 0.0.40
codegen_flags: <defaults>
</compile_context>

<pallas_src>
import jax
import jax.numpy as jnp
from jax.experimental import pallas as pl
from jax.experimental.pallas import tpu as pltpu


LATENT = 10
IMG = 28
IMG_FLAT = IMG * IMG            # 784
HIDDEN_DEC = 118
H_ENC = 32

K_IN_PAD = 896                  # 784 -> 7*128  (x / w1 contraction dim)
LAT_PAD = 128                   # 10  -> 128    (latent lane tile)
STATS_PAD = 2 * LAT_PAD         # mu in lanes [0,128), logvar in [128,256)
HID_PAD = 128                   # 118 -> 128    (decoder hidden)
RECON_PAD = 896                 # 784 -> 7*128  (lane-dense recon store)


# ---------------------------------------------------------------------------
# Fused forward kernel: 4 MXU matmuls, everything VMEM-resident.
# ---------------------------------------------------------------------------
def _vae_fused_kernel(x_ref, eps_ref,
                      w1_ref, b1_ref, w2_ref, b2_ref,
                      w3_ref, b3_ref, w4_hbm, b4_ref,
                      recon_ref, stats_ref,
                      w4_vmem, w4_sem):
    f32, bf16 = jnp.float32, jnp.bfloat16

    # Kick off the dominant fc4 weight DMA (HBM -> VMEM) immediately; it is
    # hidden behind encode + reparameterize + fc3.
    w4_copy = pltpu.make_async_copy(w4_hbm, w4_vmem, w4_sem)
    w4_copy.start()

    # encode (fc1 = Conv2d(1,32,28x28) on a 28x28 input -> 896x32 matmul).
    h1 = jnp.dot(x_ref[...], w1_ref[...], preferred_element_type=f32)
    h1 = jnp.maximum(h1 + b1_ref[...], 0.0)

    # fused mu / logvar 1x1-conv heads: one (32, 256) matmul.  mu lives in lane
    # tile [0,128), logvar in [128,256) -> slices below are free views, and the
    # (n, 256) store is lane-dense.
    stats = jnp.dot(h1.astype(bf16), w2_ref[...], preferred_element_type=f32) + b2_ref[...]
    mu = stats[:, :LAT_PAD]
    logvar = stats[:, LAT_PAD:]

    # reparameterize: z = mu + eps * exp(0.5 * logvar).  Padded lanes of z only
    # ever multiply zero rows of w3, so their values are irrelevant.
    z = mu + eps_ref[...] * jnp.exp(0.5 * logvar)

    # decode: fc3 (1x1 conv-transpose) -> ReLU.
    h3 = jnp.dot(z.astype(bf16), w3_ref[...], preferred_element_type=f32)
    h3 = jnp.maximum(h3 + b3_ref[...], 0.0)

    # fc4 (28x28 conv-transpose) needs its weights now.
    w4_copy.wait()
    logits = jnp.dot(h3.astype(bf16), w4_vmem[...], preferred_element_type=f32) + b4_ref[...]

    recon_ref[...] = jax.nn.sigmoid(logits)     # (n, 896) lane-dense store
    stats_ref[...] = stats                      # (n, 256) lane-dense store


# ---------------------------------------------------------------------------
# Parameter init: PyTorch-default-style uniform(-1/sqrt(fan_in), +), with all
# weights stored ALREADY in matmul-ready, tile-padded (K, N) layout (bf16) and
# biases pre-shaped to padded (1, N) (f32): zero layout work at runtime.
# ---------------------------------------------------------------------------
def init_params(key):
    ks = jax.random.split(key, 10)

    def u(k, shape, fan_in):
        b = 1.0 / float(fan_in) ** 0.5
        return jax.random.uniform(k, shape, jnp.float32, -b, b)

    # fc1: Conv2d(1, 32, 28x28)  weight (32,1,28,28) -> (784, 32) -> pad K to 896.
    w1 = u(ks[0], (H_ENC, 1, IMG, IMG), IMG_FLAT).reshape(H_ENC, IMG_FLAT).T
    w1 = jnp.pad(w1, ((0, K_IN_PAD - IMG_FLAT), (0, 0)))
    b1 = u(ks[1], (H_ENC,), IMG_FLAT)

    # fc21 / fc22: Conv2d(32, 10, 1x1) weights (10,32,1,1) -> (32,10) each,
    # fused + lane-tile aligned into (32, 256): mu at cols [0,10), logvar at
    # cols [128,138), zeros elsewhere.
    w21 = u(ks[2], (LATENT, H_ENC, 1, 1), H_ENC).reshape(LATENT, H_ENC).T
    b21 = u(ks[3], (LATENT,), H_ENC)
    w22 = u(ks[4], (LATENT, H_ENC, 1, 1), H_ENC).reshape(LATENT, H_ENC).T
    b22 = u(ks[5], (LATENT,), H_ENC)
    w2 = jnp.zeros((H_ENC, STATS_PAD), jnp.float32)
    w2 = w2.at[:, :LATENT].set(w21).at[:, LAT_PAD:LAT_PAD + LATENT].set(w22)
    b2 = jnp.zeros((STATS_PAD,), jnp.float32)
    b2 = b2.at[:LATENT].set(b21).at[LAT_PAD:LAT_PAD + LATENT].set(b22)

    # fc3: ConvTranspose2d(10, 118, 1x1) weight (10,118,1,1) -> (10, 118),
    # zero-padded to (128, 128); bias padded 118 -> 128.
    w3 = u(ks[6], (LATENT, HIDDEN_DEC, 1, 1), HIDDEN_DEC).reshape(LATENT, HIDDEN_DEC)
    w3 = jnp.pad(w3, ((0, LAT_PAD - LATENT), (0, HID_PAD - HIDDEN_DEC)))
    b3 = jnp.pad(u(ks[7], (HIDDEN_DEC,), HIDDEN_DEC), (0, HID_PAD - HIDDEN_DEC))

    # fc4: ConvTranspose2d(118, 1, 28x28) weight (118,1,28,28) -> (118, 784),
    # zero-padded to (128, 896) so both K and the output store are tile-aligned.
    w4 = u(ks[8], (HIDDEN_DEC, 1, IMG, IMG), IMG_FLAT).reshape(HIDDEN_DEC, IMG_FLAT)
    w4 = jnp.pad(w4, ((0, HID_PAD - HIDDEN_DEC), (0, RECON_PAD - IMG_FLAT)))
    b4s = u(ks[9], (1,), IMG_FLAT)
    b4 = jnp.pad(jnp.broadcast_to(b4s, (IMG_FLAT,)), (0, RECON_PAD - IMG_FLAT))

    # parameter count matches the PyTorch module (< 120000)
    n_params = (H_ENC * IMG_FLAT + H_ENC) + 2 * (LATENT * H_ENC + LATENT) \
               + (LATENT * HIDDEN_DEC + HIDDEN_DEC) + (HIDDEN_DEC * IMG_FLAT + 1)
    assert n_params < 120000, n_params

    bf = lambda a: a.astype(jnp.bfloat16)
    return {
        "w1": bf(w1), "b1": b1.reshape(1, H_ENC),
        "w2": bf(w2), "b2": b2.reshape(1, STATS_PAD),
        "w3": bf(w3), "b3": b3.reshape(1, HID_PAD),
        "w4": bf(w4), "b4": b4.reshape(1, RECON_PAD),
    }


def _cost_estimate(n):
    bf2, f4 = 2, 4
    flops = 2 * n * (K_IN_PAD * H_ENC + H_ENC * STATS_PAD
                     + LAT_PAD * HID_PAD + HID_PAD * RECON_PAD)
    transcendentals = n * (LAT_PAD + RECON_PAD)           # exp + sigmoid
    bytes_in = (n * K_IN_PAD * bf2 + n * LAT_PAD * f4
                + K_IN_PAD * H_ENC * bf2 + H_ENC * f4
                + H_ENC * STATS_PAD * bf2 + STATS_PAD * f4
                + LAT_PAD * HID_PAD * bf2 + HID_PAD * f4
                + HID_PAD * RECON_PAD * bf2 + RECON_PAD * f4)
    bytes_out = n * (RECON_PAD + STATS_PAD) * f4
    return pl.CostEstimate(flops=flops, transcendentals=transcendentals,
                           bytes_accessed=bytes_in + bytes_out)


# ---------------------------------------------------------------------------
# Forward pass (mirrors VAEBaselineConv.forward in training mode).
# eps is drawn from JAX's PRNG in the caller.
# TODO(synk): torch.randn_like's RNG stream inside reparameterize is not
#             replicable in JAX; eps is supplied externally instead.
# ---------------------------------------------------------------------------
def vae_forward(params, x_nchw, eps):
    n = x_nchw.shape[0]
    x_flat = x_nchw.reshape(n, IMG_FLAT).astype(jnp.bfloat16)   # C=1, (h,w) flatten
    x_pad = jnp.pad(x_flat, ((0, 0), (0, K_IN_PAD - IMG_FLAT)))
    eps_pad = jnp.pad(eps.astype(jnp.float32), ((0, 0), (0, LAT_PAD - LATENT)))

    vmem = lambda: pl.BlockSpec(memory_space=pltpu.MemorySpace.VMEM)
    hbm = pl.BlockSpec(memory_space=pl.ANY)     # fc4 weight: manual overlapped DMA

    recon_pad, stats = pl.pallas_call(
        _vae_fused_kernel,
        out_shape=(
            jax.ShapeDtypeStruct((n, RECON_PAD), jnp.float32),
            jax.ShapeDtypeStruct((n, STATS_PAD), jnp.float32),
        ),
        in_specs=[vmem(), vmem(),            # x, eps
                  vmem(), vmem(),            # w1, b1
                  vmem(), vmem(),            # w2, b2
                  vmem(), vmem(),            # w3, b3
                  hbm, vmem()],              # w4 (HBM), b4
        out_specs=(vmem(), vmem()),
        scratch_shapes=[pltpu.VMEM((HID_PAD, RECON_PAD), jnp.bfloat16),
                        pltpu.SemaphoreType.DMA(())],
        cost_estimate=_cost_estimate(n),
    )(x_pad, eps_pad,
      params["w1"], params["b1"], params["w2"], params["b2"],
      params["w3"], params["b3"], params["w4"], params["b4"])

    recon = recon_pad[:, :IMG_FLAT].reshape(n, 1, IMG, IMG)
    # mu / logvar come out of 1x1 convs in PyTorch -> shape (n, latent, 1, 1)
    mu = stats[:, :LATENT].reshape(n, LATENT, 1, 1)
    logvar = stats[:, LAT_PAD:LAT_PAD + LATENT].reshape(n, LATENT, 1, 1)
    return recon, mu, logvar


# ---------------------------------------------------------------------------
# Pure-JAX reference with identical (padded, bf16-operand / f32-accumulate) math.
# ---------------------------------------------------------------------------
def vae_reference(params, x_nchw, eps):
    f32, bf16 = jnp.float32, jnp.bfloat16
    n = x_nchw.shape[0]
    x = jnp.pad(x_nchw.reshape(n, IMG_FLAT).astype(bf16),
                ((0, 0), (0, K_IN_PAD - IMG_FLAT)))
    eps_pad = jnp.pad(eps.astype(f32), ((0, 0), (0, LAT_PAD - LATENT)))

    h1 = jnp.maximum(
        jnp.dot(x, params["w1"], preferred_element_type=f32) + params["b1"], 0.0)
    stats = jnp.dot(h1.astype(bf16), params["w2"], preferred_element_type=f32) + params["b2"]
    mu, logvar = stats[:, :LAT_PAD], stats[:, LAT_PAD:]
    z = mu + eps_pad * jnp.exp(0.5 * logvar)
    h3 = jnp.maximum(
        jnp.dot(z.astype(bf16), params["w3"], preferred_element_type=f32) + params["b3"], 0.0)
    logits = jnp.dot(h3.astype(bf16), params["w4"], preferred_element_type=f32) + params["b4"]
    recon = jax.nn.sigmoid(logits)[:, :IMG_FLAT].reshape(n, 1, IMG, IMG)
    return (recon,
            stats[:, :LATENT].reshape(n, LATENT, 1, 1),
            stats[:, LAT_PAD:LAT_PAD + LATENT].reshape(n, LATENT, 1, 1))


if __name__ == "__main__":
    key = jax.random.PRNGKey(0)
    pkey, xkey, ekey = jax.random.split(key, 3)

    params = init_params(pkey)
    x = jax.random.uniform(xkey, (2, 1, IMG, IMG), jnp.float32)
    eps = jax.random.normal(ekey, (2, LATENT), jnp.float32)

    recon, mu, logvar = jax.jit(vae_forward)(params, x, eps)
    jax.block_until_ready((recon, mu, logvar))

    assert recon.shape == (2, 1, IMG, IMG)
    assert mu.shape == (2, LATENT, 1, 1) and logvar.shape == (2, LATENT, 1, 1)
    assert bool(jnp.all(jnp.isfinite(recon)))
    assert bool(jnp.all((recon >= 0.0) & (recon <= 1.0)))   # sigmoid output range

    r_ref, m_ref, lv_ref = vae_reference(params, x, eps)
    assert bool(jnp.allclose(recon, r_ref, atol=5e-3, rtol=5e-3))
    assert bool(jnp.allclose(mu, m_ref, atol=5e-3, rtol=5e-3))
    assert bool(jnp.allclose(logvar, lv_ref, atol=5e-3, rtol=5e-3))

    print("KERNEL_OK")
</pallas_src>

<mosaic_0001>
module attributes {stable_mosaic.version = 11 : i64} {
  func.func @_vae_fused_kernel(%arg0: memref<2x896xbf16, #tpu.memory_space<vmem>>, %arg1: memref<2x128xf32, #tpu.memory_space<vmem>>, %arg2: memref<896x32xbf16, #tpu.memory_space<vmem>>, %arg3: memref<1x32xf32, #tpu.memory_space<vmem>>, %arg4: memref<32x256xbf16, #tpu.memory_space<vmem>>, %arg5: memref<1x256xf32, #tpu.memory_space<vmem>>, %arg6: memref<128x128xbf16, #tpu.memory_space<vmem>>, %arg7: memref<1x128xf32, #tpu.memory_space<vmem>>, %arg8: memref<128x896xbf16, #tpu.memory_space<any>>, %arg9: memref<1x896xf32, #tpu.memory_space<vmem>>, %arg10: memref<2x896xf32, #tpu.memory_space<vmem>>, %arg11: memref<2x256xf32, #tpu.memory_space<vmem>>, %arg12: memref<128x896xbf16, #tpu.memory_space<vmem>>, %arg13: memref<!tpu.dma_semaphore, #tpu.memory_space<semaphore_mem>>) attributes {dimension_semantics = [], scalar_prefetch = 0 : i64, scratch_operands = 2 : i64, tpu.core_type = #tpu.core_type<tc>} {
    tpu.enqueue_dma source(%arg8 : memref<128x896xbf16, #tpu.memory_space<any>>) target(%arg12 : memref<128x896xbf16, #tpu.memory_space<vmem>>) target_semaphore(%arg13 : memref<!tpu.dma_semaphore, #tpu.memory_space<semaphore_mem>>)
    %c0 = arith.constant 0 : index
    %c0_0 = arith.constant 0 : index
    %0 = vector.load %arg0[%c0, %c0_0] : memref<2x896xbf16, #tpu.memory_space<vmem>>, vector<2x896xbf16>
    %c0_1 = arith.constant 0 : index
    %c0_2 = arith.constant 0 : index
    %1 = vector.load %arg2[%c0_1, %c0_2] : memref<896x32xbf16, #tpu.memory_space<vmem>>, vector<896x32xbf16>
    %cst = arith.constant dense<0.000000e+00> : vector<2x32xf32>
    %2 = tpu.matmul %0, %1, %cst {dimension_numbers = #tpu.dot_dimension_numbers<[1], [0], [0], [1], [0, 0, 1, 1], [], []>} : vector<2x896xbf16>, vector<896x32xbf16>, vector<2x32xf32> -> vector<2x32xf32>
    %c0_3 = arith.constant 0 : index
    %c0_4 = arith.constant 0 : index
    %3 = vector.load %arg3[%c0_3, %c0_4] : memref<1x32xf32, #tpu.memory_space<vmem>>, vector<1x32xf32>
    %4 = vector.broadcast %3 : vector<1x32xf32> to vector<2x32xf32>
    %5 = arith.addf %2, %4 : vector<2x32xf32>
    %cst_5 = arith.constant 0.000000e+00 : f32
    %6 = vector.broadcast %cst_5 : f32 to vector<2x32xf32>
    %7 = arith.maximumf %5, %6 : vector<2x32xf32>
    %8 = arith.truncf %7 : vector<2x32xf32> to vector<2x32xbf16>
    %c0_6 = arith.constant 0 : index
    %c0_7 = arith.constant 0 : index
    %9 = vector.load %arg4[%c0_6, %c0_7] : memref<32x256xbf16, #tpu.memory_space<vmem>>, vector<32x256xbf16>
    %cst_8 = arith.constant dense<0.000000e+00> : vector<2x256xf32>
    %10 = tpu.matmul %8, %9, %cst_8 {dimension_numbers = #tpu.dot_dimension_numbers<[1], [0], [0], [1], [0, 0, 1, 1], [], []>} : vector<2x32xbf16>, vector<32x256xbf16>, vector<2x256xf32> -> vector<2x256xf32>
    %c0_9 = arith.constant 0 : index
    %c0_10 = arith.constant 0 : index
    %11 = vector.load %arg5[%c0_9, %c0_10] : memref<1x256xf32, #tpu.memory_space<vmem>>, vector<1x256xf32>
    %12 = vector.broadcast %11 : vector<1x256xf32> to vector<2x256xf32>
    %13 = arith.addf %10, %12 : vector<2x256xf32>
    %14 = vector.extract_strided_slice %13 {offsets = [0, 0], sizes = [2, 128], strides = [1, 1]} : vector<2x256xf32> to vector<2x128xf32>
    %15 = vector.extract_strided_slice %13 {offsets = [0, 128], sizes = [2, 128], strides = [1, 1]} : vector<2x256xf32> to vector<2x128xf32>
    %c0_11 = arith.constant 0 : index
    %c0_12 = arith.constant 0 : index
    %16 = vector.load %arg1[%c0_11, %c0_12] : memref<2x128xf32, #tpu.memory_space<vmem>>, vector<2x128xf32>
    %cst_13 = arith.constant 5.000000e-01 : f32
    %17 = vector.broadcast %cst_13 : f32 to vector<2x128xf32>
    %18 = arith.mulf %17, %15 : vector<2x128xf32>
    %19 = math.exp %18 : vector<2x128xf32>
    %20 = arith.mulf %16, %19 : vector<2x128xf32>
    %21 = arith.addf %14, %20 : vector<2x128xf32>
    %22 = arith.truncf %21 : vector<2x128xf32> to vector<2x128xbf16>
    %c0_14 = arith.constant 0 : index
    %c0_15 = arith.constant 0 : index
    %23 = vector.load %arg6[%c0_14, %c0_15] : memref<128x128xbf16, #tpu.memory_space<vmem>>, vector<128x128xbf16>
    %cst_16 = arith.constant dense<0.000000e+00> : vector<2x128xf32>
    %24 = tpu.matmul %22, %23, %cst_16 {dimension_numbers = #tpu.dot_dimension_numbers<[1], [0], [0], [1], [0, 0, 1, 1], [], []>} : vector<2x128xbf16>, vector<128x128xbf16>, vector<2x128xf32> -> vector<2x128xf32>
    %c0_17 = arith.constant 0 : index
    %c0_18 = arith.constant 0 : index
    %25 = vector.load %arg7[%c0_17, %c0_18] : memref<1x128xf32, #tpu.memory_space<vmem>>, vector<1x128xf32>
    %26 = vector.broadcast %25 : vector<1x128xf32> to vector<2x128xf32>
    %27 = arith.addf %24, %26 : vector<2x128xf32>
    %cst_19 = arith.constant 0.000000e+00 : f32
    %28 = vector.broadcast %cst_19 : f32 to vector<2x128xf32>
    %29 = arith.maximumf %27, %28 : vector<2x128xf32>
    tpu.wait_dma2 semaphore(%arg13 : memref<!tpu.dma_semaphore, #tpu.memory_space<semaphore_mem>>) src(%arg8 : memref<128x896xbf16, #tpu.memory_space<any>>) dst(%arg12 : memref<128x896xbf16, #tpu.memory_space<vmem>>)
    %30 = arith.truncf %29 : vector<2x128xf32> to vector<2x128xbf16>
    %c0_20 = arith.constant 0 : index
    %c0_21 = arith.constant 0 : index
    %31 = vector.load %arg12[%c0_20, %c0_21] : memref<128x896xbf16, #tpu.memory_space<vmem>>, vector<128x896xbf16>
    %cst_22 = arith.constant dense<0.000000e+00> : vector<2x896xf32>
    %32 = tpu.matmul %30, %31, %cst_22 {dimension_numbers = #tpu.dot_dimension_numbers<[1], [0], [0], [1], [0, 0, 1, 1], [], []>} : vector<2x128xbf16>, vector<128x896xbf16>, vector<2x896xf32> -> vector<2x896xf32>
    %c0_23 = arith.constant 0 : index
    %c0_24 = arith.constant 0 : index
    %33 = vector.load %arg9[%c0_23, %c0_24] : memref<1x896xf32, #tpu.memory_space<vmem>>, vector<1x896xf32>
    %34 = vector.broadcast %33 : vector<1x896xf32> to vector<2x896xf32>
    %35 = arith.addf %32, %34 : vector<2x896xf32>
    %36 = arith.negf %35 : vector<2x896xf32>
    %37 = math.exp %36 : vector<2x896xf32>
    %cst_25 = arith.constant 1.000000e+00 : f32
    %38 = vector.broadcast %cst_25 : f32 to vector<2x896xf32>
    %39 = arith.addf %38, %37 : vector<2x896xf32>
    %40 = arith.divf %38, %39 : vector<2x896xf32>
    %c0_26 = arith.constant 0 : index
    %c0_27 = arith.constant 0 : index
    %41 = vector.load %arg10[%c0_26, %c0_27] : memref<2x896xf32, #tpu.memory_space<vmem>>, vector<2x896xf32>
    tpu.vector_store %arg10[%c0_26, %c0_27], %40 {strides = array<i32>} : memref<2x896xf32, #tpu.memory_space<vmem>>, vector<2x896xf32>,
    %c0_28 = arith.constant 0 : index
    %c0_29 = arith.constant 0 : index
    %42 = vector.load %arg11[%c0_28, %c0_29] : memref<2x256xf32, #tpu.memory_space<vmem>>, vector<2x256xf32>
    tpu.vector_store %arg11[%c0_28, %c0_29], %13 {strides = array<i32>} : memref<2x256xf32, #tpu.memory_space<vmem>>, vector<2x256xf32>,
    return
  }
}

</mosaic_0001>

<bundles_post_ra>
// kernel: vae_forward.1
= control target key start
LH: loop header
LB: loop body
LE: loop exit
PB: predicated region body
PF: predicated region fallthrough
CT: control target
= control target key end

     0   :  { %s2742_s0 = inlined_call_operand.vmem [shape: bf16[2,896], index: 0, kind: input, shape index: {}]   ;;  %s2743_s1 = inlined_call_operand.vmem [shape: f32[2,128], index: 1, kind: input, shape index: {}]   ;;  %s2744_s2 = inlined_call_operand.vmem [shape: bf16[896,32], index: 2, kind: input, shape index: {}]   ;;  %s2745_s3 = inlined_call_operand.vmem [shape: f32[1,32], index: 3, kind: input, shape index: {}]   ;;  %s2746_s4 = inlined_call_operand.vmem [shape: bf16[32,256], index: 4, kind: input, shape index: {}]   ;;  %s2747_s5 = inlined_call_operand.vmem [shape: f32[1,256], index: 5, kind: input, shape index: {}]   ;;  %s2748_s6 = inlined_call_operand.vmem [shape: bf16[128,128], index: 6, kind: input, shape index: {}]   ;;  %s2749_s7 = inlined_call_operand.vmem [shape: f32[1,128], index: 7, kind: input, shape index: {}]   ;;  %s2750_s8 = inlined_call_operand.vmem [shape: bf16[128,896], index: 8, kind: input, shape index: {}]   ;;  %s2751_s9 = inlined_call_operand.vmem [shape: f32[1,896], index: 9, kind: input, shape index: {}]   ;;  %s2752_s10 = inlined_call_operand.vmem [shape: f32[2,896], index: 10, kind: output, shape index: {0}]   ;;  %s2753_s11 = inlined_call_operand.vmem [shape: f32[2,256], index: 11, kind: output, shape index: {1}]  }
   0x1   :  { %v46_v0 = vld [vmem:[%s2750_s8] sm:$0xff]  ;;  %v48_v1 = vld [vmem:[%s2750_s8 + $0x8] sm:$0xff]  ;;  %v50_v2 = vld [vmem:[%s2750_s8 + $0x10] sm:$0xff] }
   0x2   :  { %47 = vst [vmem:[#allocation2] sm:$0xff] %v46_v0  ;;  %v52_v3 = vld [vmem:[%s2750_s8 + $0x18] sm:$0xff]  ;;  %v54_v4 = vld [vmem:[%s2750_s8 + $0x20] sm:$0xff]  ;;  %v56_v5 = vld [vmem:[%s2750_s8 + $0x28] sm:$0xff] }
   0x3   :  { %49 = vst [vmem:[#allocation2 + $0x8] sm:$0xff] %v48_v1  ;;  %v58_v6 = vld [vmem:[%s2750_s8 + $0x30] sm:$0xff]  ;;  %v60_v7 = vld [vmem:[%s2750_s8 + $0x38] sm:$0xff]  ;;  %v62_v8 = vld [vmem:[%s2750_s8 + $0x40] sm:$0xff] }
   0x4   :  { %51 = vst [vmem:[#allocation2 + $0x10] sm:$0xff] %v50_v2  ;;  %v64_v9 = vld [vmem:[%s2750_s8 + $0x48] sm:$0xff]  ;;  %v66_v10 = vld [vmem:[%s2750_s8 + $0x50] sm:$0xff]  ;;  %v68_v11 = vld [vmem:[%s2750_s8 + $0x58] sm:$0xff] }
   0x5   :  { %53 = vst [vmem:[#allocation2 + $0x18] sm:$0xff] %v52_v3  ;;  %v70_v12 = vld [vmem:[%s2750_s8 + $0x60] sm:$0xff]  ;;  %v72_v13 = vld [vmem:[%s2750_s8 + $0x68] sm:$0xff]  ;;  %v74_v14 = vld [vmem:[%s2750_s8 + $0x70] sm:$0xff] }
   0x6   :  { %55 = vst [vmem:[#allocation2 + $0x20] sm:$0xff] %v54_v4  ;;  %v76_v15 = vld [vmem:[%s2750_s8 + $0x78] sm:$0xff]  ;;  %v78_v16 = vld [vmem:[%s2750_s8 + $0x80] sm:$0xff]  ;;  %v80_v17 = vld [vmem:[%s2750_s8 + $0x88] sm:$0xff] }
   0x7   :  { %57 = vst [vmem:[#allocation2 + $0x28] sm:$0xff] %v56_v5  ;;  %v82_v18 = vld [vmem:[%s2750_s8 + $0x90] sm:$0xff]  ;;  %v84_v19 = vld [vmem:[%s2750_s8 + $0x98] sm:$0xff]  ;;  %v86_v20 = vld [vmem:[%s2750_s8 + $0xa0] sm:$0xff] }
   0x8   :  { %59 = vst [vmem:[#allocation2 + $0x30] sm:$0xff] %v58_v6  ;;  %v88_v21 = vld [vmem:[%s2750_s8 + $0xa8] sm:$0xff]  ;;  %v90_v22 = vld [vmem:[%s2750_s8 + $0xb0] sm:$0xff]  ;;  %v92_v23 = vld [vmem:[%s2750_s8 + $0xb8] sm:$0xff] }
   0x9   :  { %61 = vst [vmem:[#allocation2 + $0x38] sm:$0xff] %v60_v7  ;;  %v94_v24 = vld [vmem:[%s2750_s8 + $0xc0] sm:$0xff]  ;;  %v96_v25 = vld [vmem:[%s2750_s8 + $0xc8] sm:$0xff]  ;;  %v98_v26 = vld [vmem:[%s2750_s8 + $0xd0] sm:$0xff] }
   0xa   :  { %63 = vst [vmem:[#allocation2 + $0x40] sm:$0xff] %v62_v8  ;;  %v100_v27 = vld [vmem:[%s2750_s8 + $0xd8] sm:$0xff]  ;;  %v102_v28 = vld [vmem:[%s2750_s8 + $0xe0] sm:$0xff]  ;;  %v104_v29 = vld [vmem:[%s2750_s8 + $0xe8] sm:$0xff] }
   0xb   :  { %65 = vst [vmem:[#allocation2 + $0x48] sm:$0xff] %v64_v9  ;;  %v106_v30 = vld [vmem:[%s2750_s8 + $0xf0] sm:$0xff]  ;;  %v108_v31 = vld [vmem:[%s2750_s8 + $0xf8] sm:$0xff]  ;;  %v110_v32 = vld [vmem:[%s2750_s8 + $0x100] sm:$0xff] }
   0xc   :  { %67 = vst [vmem:[#allocation2 + $0x50] sm:$0xff] %v66_v10  ;;  %v112_v33 = vld [vmem:[%s2750_s8 + $0x108] sm:$0xff]  ;;  %v114_v34 = vld [vmem:[%s2750_s8 + $0x110] sm:$0xff]  ;;  %v116_v35 = vld [vmem:[%s2750_s8 + $0x118] sm:$0xff] }
   0xd   :  { %69 = vst [vmem:[#allocation2 + $0x58] sm:$0xff] %v68_v11  ;;  %v118_v36 = vld [vmem:[%s2750_s8 + $0x120] sm:$0xff]  ;;  %v120_v37 = vld [vmem:[%s2750_s8 + $0x128] sm:$0xff]  ;;  %v122_v38 = vld [vmem:[%s2750_s8 + $0x130] sm:$0xff] }
   0xe   :  { %71 = vst [vmem:[#allocation2 + $0x60] sm:$0xff] %v70_v12  ;;  %v124_v39 = vld [vmem:[%s2750_s8 + $0x138] sm:$0xff]  ;;  %v126_v40 = vld [vmem:[%s2750_s8 + $0x140] sm:$0xff]  ;;  %v128_v41 = vld [vmem:[%s2750_s8 + $0x148] sm:$0xff] }
   0xf   :  { %73 = vst [vmem:[#allocation2 + $0x68] sm:$0xff] %v72_v13  ;;  %v130_v42 = vld [vmem:[%s2750_s8 + $0x150] sm:$0xff]  ;;  %v132_v43 = vld [vmem:[%s2750_s8 + $0x158] sm:$0xff]  ;;  %v134_v44 = vld [vmem:[%s2750_s8 + $0x160] sm:$0xff] }
  0x10   :  { %75 = vst [vmem:[#allocation2 + $0x70] sm:$0xff] %v74_v14  ;;  %v136_v45 = vld [vmem:[%s2750_s8 + $0x168] sm:$0xff]  ;;  %v138_v46 = vld [vmem:[%s2750_s8 + $0x170] sm:$0xff]  ;;  %v140_v47 = vld [vmem:[%s2750_s8 + $0x178] sm:$0xff] }
  0x11   :  { %77 = vst [vmem:[#allocation2 + $0x78] sm:$0xff] %v76_v15  ;;  %v142_v48 = vld [vmem:[%s2750_s8 + $0x180] sm:$0xff]  ;;  %v144_v49 = vld [vmem:[%s2750_s8 + $0x188] sm:$0xff]  ;;  %v146_v50 = vld [vmem:[%s2750_s8 + $0x190] sm:$0xff] }
  0x12   :  { %79 = vst [vmem:[#allocation2 + $0x80] sm:$0xff] %v78_v16  ;;  %v148_v51 = vld [vmem:[%s2750_s8 + $0x198] sm:$0xff]  ;;  %v150_v52 = vld [vmem:[%s2750_s8 + $0x1a0] sm:$0xff]  ;;  %v152_v53 = vld [vmem:[%s2750_s8 + $0x1a8] sm:$0xff] }
  0x13   :  { %81 = vst [vmem:[#allocation2 + $0x88] sm:$0xff] %v80_v17  ;;  %v154_v54 = vld [vmem:[%s2750_s8 + $0x1b0] sm:$0xff]  ;;  %v156_v55 = vld [vmem:[%s2750_s8 + $0x1b8] sm:$0xff] }
  0x14   :  { %83 = vst [vmem:[#allocation2 + $0x90] sm:$0xff] %v82_v18 }
  0x15   :  { %85 = vst [vmem:[#allocation2 + $0x98] sm:$0xff] %v84_v19 }
  0x16   :  { %87 = vst [vmem:[#allocation2 + $0xa0] sm:$0xff] %v86_v20 }
  0x17   :  { %89 = vst [vmem:[#allocation2 + $0xa8] sm:$0xff] %v88_v21 }
  0x18   :  { %91 = vst [vmem:[#allocation2 + $0xb0] sm:$0xff] %v90_v22 }
  0x19   :  { %93 = vst [vmem:[#allocation2 + $0xb8] sm:$0xff] %v92_v23 }
  0x1a   :  { %95 = vst [vmem:[#allocation2 + $0xc0] sm:$0xff] %v94_v24 }
  0x1b   :  { %97 = vst [vmem:[#allocation2 + $0xc8] sm:$0xff] %v96_v25 }
  0x1c   :  { %99 = vst [vmem:[#allocation2 + $0xd0] sm:$0xff] %v98_v26 }
  0x1d   :  { %101 = vst [vmem:[#allocation2 + $0xd8] sm:$0xff] %v100_v27 }
  0x1e   :  { %103 = vst [vmem:[#allocation2 + $0xe0] sm:$0xff] %v102_v28 }
  0x1f   :  { %105 = vst [vmem:[#allocation2 + $0xe8] sm:$0xff] %v104_v29 }
  0x20   :  { %107 = vst [vmem:[#allocation2 + $0xf0] sm:$0xff] %v106_v30 }
  0x21   :  { %109 = vst [vmem:[#allocation2 + $0xf8] sm:$0xff] %v108_v31 }
  0x22   :  { %111 = vst [vmem:[#allocation2 + $0x100] sm:$0xff] %v110_v32 }
  0x23   :  { %113 = vst [vmem:[#allocation2 + $0x108] sm:$0xff] %v112_v33 }
  0x24   :  { %115 = vst [vmem:[#allocation2 + $0x110] sm:$0xff] %v114_v34 }
  0x25   :  { %117 = vst [vmem:[#allocation2 + $0x118] sm:$0xff] %v116_v35 }
  0x26   :  { %119 = vst [vmem:[#allocation2 + $0x120] sm:$0xff] %v118_v36 }
  0x27   :  { %121 = vst [vmem:[#allocation2 + $0x128] sm:$0xff] %v120_v37 }
  0x28   :  { %123 = vst [vmem:[#allocation2 + $0x130] sm:$0xff] %v122_v38 }
  0x29   :  { %125 = vst [vmem:[#allocation2 + $0x138] sm:$0xff] %v124_v39 }
  0x2a   :  { %127 = vst [vmem:[#allocation2 + $0x140] sm:$0xff] %v126_v40 }
  0x2b   :  { %129 = vst [vmem:[#allocation2 + $0x148] sm:$0xff] %v128_v41 }
  0x2c   :  { %131 = vst [vmem:[#allocation2 + $0x150] sm:$0xff] %v130_v42 }
  0x2d   :  { %133 = vst [vmem:[#allocation2 + $0x158] sm:$0xff] %v132_v43 }
  0x2e   :  { %135 = vst [vmem:[#allocation2 + $0x160] sm:$0xff] %v134_v44 }
  0x2f   :  { %137 = vst [vmem:[#allocation2 + $0x168] sm:$0xff] %v136_v45 }
  0x30   :  { %139 = vst [vmem:[#allocation2 + $0x170] sm:$0xff] %v138_v46 }
  0x31   :  { %141 = vst [vmem:[#allocation2 + $0x178] sm:$0xff] %v140_v47 }
  0x32   :  { %143 = vst [vmem:[#allocation2 + $0x180] sm:$0xff] %v142_v48 }
  0x33   :  { %145 = vst [vmem:[#allocation2 + $0x188] sm:$0xff] %v144_v49 }
  0x34   :  { %147 = vst [vmem:[#allocation2 + $0x190] sm:$0xff] %v146_v50 }
  0x35   :  { %149 = vst [vmem:[#allocation2 + $0x198] sm:$0xff] %v148_v51 }
  0x36   :  { %151 = vst [vmem:[#allocation2 + $0x1a0] sm:$0xff] %v150_v52 }
  0x37   :  { %153 = vst [vmem:[#allocation2 + $0x1a8] sm:$0xff] %v152_v53 }
  0x38   :  { %155 = vst [vmem:[#allocation2 + $0x1b0] sm:$0xff] %v154_v54 }
  0x39   :  { %157 = vst [vmem:[#allocation2 + $0x1b8] sm:$0xff] %v156_v55 }
  0x3a   :  { %163 = vsyncadd [#allocation3], 7168  ;;  %v2033_v56 = vld [vmem:[%s2744_s2 + $0x38] sm:$0xff]  ;;  %v2032_v59 = vld [vmem:[%s2744_s2 + $0x30] sm:$0xff]  ;;  %vm756_vm0 = vcmask 261120  }
  0x3b   :  { %v2041_v57 = vld [vmem:[%s2744_s2 + $0x78] sm:$0xff]  ;;  %633 = vmatpush.bf16.msra.mxu0 %v2033_v56  ;;  %v2040_v60 = vld [vmem:[%s2744_s2 + $0x70] sm:$0xff]  ;;  %v2031_v63 = vld [vmem:[%s2744_s2 + $0x28] sm:$0xff] }
  0x3c   :  { %v2049_v58 = vld [vmem:[%s2744_s2 + $0xb8] sm:$0xff]  ;;  %646 = vmatpush.bf16.msra.mxu1 %v2041_v57  ;;  %v2048_v61 = vld [vmem:[%s2744_s2 + $0xb0] sm:$0xff]  ;;  %v2039_v0 = vld [vmem:[%s2744_s2 + $0x68] sm:$0xff] }
  0x3d   :  { %659 = vmatpush.bf16.msra.mxu2 %v2049_v58  ;;  %v2057_v62 = vld [vmem:[%s2744_s2 + $0xf8] sm:$0xff]  ;;  %v2047_v1 = vld [vmem:[%s2744_s2 + $0xa8] sm:$0xff]  ;;  %v2056_v2 = vld [vmem:[%s2744_s2 + $0xf0] sm:$0xff] }
  0x3e   :  { %672 = vmatpush.bf16.msra.mxu3 %v2057_v62  ;;  %v2030_v3 = vld [vmem:[%s2744_s2 + $0x20] sm:$0xff]  ;;  %v2055_v6 = vld [vmem:[%s2744_s2 + $0xe8] sm:$0xff]  ;;  %v2029_v8 = vld [vmem:[%s2744_s2 + $0x18] sm:$0xff] }
  0x3f   :  { %634 = vmatpush.bf16.msra.mxu0 %v2032_v59  ;;  %v2038_v4 = vld [vmem:[%s2744_s2 + $0x60] sm:$0xff]  ;;  %v2037_v9 = vld [vmem:[%s2744_s2 + $0x58] sm:$0xff]  ;;  %v2028_v12 = vld [vmem:[%s2744_s2 + $0x10] sm:$0xff] }
  0x40   :  { %647 = vmatpush.bf16.msra.mxu1 %v2040_v60  ;;  %v2046_v5 = vld [vmem:[%s2744_s2 + $0xa0] sm:$0xff]  ;;  %v2045_v10 = vld [vmem:[%s2744_s2 + $0x98] sm:$0xff]  ;;  %v2036_v13 = vld [vmem:[%s2744_s2 + $0x50] sm:$0xff] }
  0x41   :  { %660 = vmatpush.bf16.msra.mxu2 %v2048_v61  ;;  %v164_v7 = vld [vmem:[%s2742_s0] sm:$0x7f]  ;;  %v2044_v14 = vld [vmem:[%s2744_s2 + $0x90] sm:$0xff]  ;;  %v2053_v15 = vld [vmem:[%s2744_s2 + $0xd8] sm:$0xff] }
  0x42   :  { %673 = vmatpush.bf16.msra.mxu3 %v2056_v2  ;;  %282 = vst [vmem:[#allocation1] ss:$9 sm:$0xff] %v164_v7  ;;  %v2054_v11 = vld [vmem:[%s2744_s2 + $0xe0] sm:$0xff]  ;;  %v2027_v16 = vld [vmem:[%s2744_s2 + $0x8] sm:$0xff]  ;;  %v2052_v19 = vld [vmem:[%s2744_s2 + $0xd0] sm:$0xff] }
  0x43   :  { %635 = vmatpush.bf16.msra.mxu0 %v2031_v63  ;;  %v2035_v17 = vld [vmem:[%s2744_s2 + $0x48] sm:$0xff]  ;;  %v2026_v20 = vld [vmem:[%s2744_s2] sm:$0xff]  ;;  %v2065_v23 = vld [vmem:[%s2744_s2 + $0x138] sm:$0xff] }
  0x44   :  { %648 = vmatpush.bf16.msra.mxu1 %v2039_v0  ;;  %v2043_v18 = vld [vmem:[%s2744_s2 + $0x88] sm:$0xff]  ;;  %v2034_v21 = vld [vmem:[%s2744_s2 + $0x40] sm:$0xff]  ;;  %v2073_v24 = vld [vmem:[%s2744_s2 + $0x178] sm:$0xff] }
  0x45   :  { %661 = vmatpush.bf16.msra.mxu2 %v2047_v1  ;;  %v2042_v22 = vld [vmem:[%s2744_s2 + $0x80] sm:$0xff]  ;;  %v2081_v25 = vld [vmem:[%s2744_s2 + $0x1b8] sm:$0xff]  ;;  %v2051_v26 = vld [vmem:[%s2744_s2 + $0xc8] sm:$0xff] }
  0x46   :  { %674 = vmatpush.bf16.msra.mxu3 %v2055_v6  ;;  %v2064_v28 = vld [vmem:[%s2744_s2 + $0x130] sm:$0xff]  ;;  %v2050_v33 = vld [vmem:[%s2744_s2 + $0xc0] sm:$0xff]  ;;  %v2063_v34 = vld [vmem:[%s2744_s2 + $0x128] sm:$0xff] }
  0x47   :  { %636 = vmatpush.bf16.msra.mxu0 %v2030_v3  ;;  %v2072_v31 = vld [vmem:[%s2744_s2 + $0x170] sm:$0xff]  ;;  %v2071_v35 = vld [vmem:[%s2744_s2 + $0x168] sm:$0xff]  ;;  %v2062_v38 = vld [vmem:[%s2744_s2 + $0x120] sm:$0xff] }
  0x48   :  { %649 = vmatpush.bf16.msra.mxu1 %v2038_v4  ;;  %v2080_v32 = vld [vmem:[%s2744_s2 + $0x1b0] sm:$0xff]  ;;  %v2079_v36 = vld [vmem:[%s2744_s2 + $0x1a8] sm:$0xff]  ;;  %v2070_v39 = vld [vmem:[%s2744_s2 + $0x160] sm:$0xff] }
  0x49   :  { %662 = vmatpush.bf16.msra.mxu2 %v2046_v5  ;;  %v283_v27 = vld [vmem:[#allocation1] sm:$0xff]  ;;  %v285_v29 = vld [vmem:[#allocation1 + $0x12] sm:$0xff]  ;;  %v284_v30 = vld [vmem:[#allocation1 + $0x9] sm:$0xff] }
  0x4a   :  { %675 = vmatpush.bf16.msra.mxu3 %v2054_v11  ;;  %v286_v37 = vld [vmem:[#allocation1 + $0x1b] sm:$0xff]  ;;  %v2060_v44 = vld [vmem:[%s2744_s2 + $0x110] sm:$0xff]  ;;  %v2059_v47 = vld [vmem:[%s2744_s2 + $0x108] sm:$0xff] }
  0x4b   :  { %637 = vmatpush.bf16.msra.mxu0 %v2029_v8  ;;  %v2078_v40 = vld [vmem:[%s2744_s2 + $0x1a0] sm:$0xff]  ;;  %v2061_v41 = vld [vmem:[%s2744_s2 + $0x118] sm:$0xff]  ;;  %v2068_v45 = vld [vmem:[%s2744_s2 + $0x150] sm:$0xff] }
  0x4c   :  { %650 = vmatpush.bf16.msra.mxu1 %v2037_v9  ;;  %v2069_v42 = vld [vmem:[%s2744_s2 + $0x158] sm:$0xff]  ;;  %v2076_v46 = vld [vmem:[%s2744_s2 + $0x190] sm:$0xff]  ;;  %v2067_v48 = vld [vmem:[%s2744_s2 + $0x148] sm:$0xff] }
  0x4d   :  { %663 = vmatpush.bf16.msra.mxu2 %v2045_v10  ;;  %v2077_v43 = vld [vmem:[%s2744_s2 + $0x198] sm:$0xff]  ;;  %v2075_v49 = vld [vmem:[%s2744_s2 + $0x188] sm:$0xff]  ;;  %v2058_v50 = vld [vmem:[%s2744_s2 + $0x100] sm:$0xff] }
  0x4e   :  { %676 = vmatpush.bf16.msra.mxu3 %v2053_v15  ;;  %v2066_v51 = vld [vmem:[%s2744_s2 + $0x140] sm:$0xff]  ;;  %v288_v54 = vld [vmem:[#allocation1 + $0x2d] sm:$0xff]  ;;  %v289_v55 = vld [vmem:[#allocation1 + $0x36] sm:$0xff] }
  0x4f   :  { %638 = vmatpush.bf16.msra.mxu0 %v2028_v12  ;;  %v2074_v52 = vld [vmem:[%s2744_s2 + $0x180] sm:$0xff]  ;;  %v1754_v56 = vld [vmem:[%s2746_s4 + $0x10] sm:$0xf]  ;;  %v2085_v57 = vld [vmem:[%s2746_s4 + $0x14] sm:$0xf0] }
  0x50   :  { %651 = vmatpush.bf16.msra.mxu1 %v2036_v13  ;;  %v287_v53 = vld [vmem:[#allocation1 + $0x24] sm:$0xff]  ;;  %v1755_v58 = vor.u32 %v2085_v57, %v1754_v56  ;;  %v1746_v60 = vld [vmem:[%s2746_s4] sm:$0xf]  ;;  %v2084_v3 = vld [vmem:[%s2746_s4 + $0x14] sm:$0xf] }
  0x51   :  { %664 = vmatpush.bf16.msra.mxu2 %v2044_v14  ;;  %v2083_v61 = vld [vmem:[%s2746_s4 + $0x4] sm:$0xf0]  ;;  %v1756_v4 = vld [vmem:[%s2746_s4 + $0x18] sm:$0xf0]  ;;  %v2082_v6 = vld [vmem:[%s2746_s4 + $0x4] sm:$0xf] }
  0x52   :  { %677 = vmatpush.bf16.msra.mxu3 %v2052_v19  ;;  %v1747_v63 = vor.u32 %v2083_v61, %v1746_v60  ;;  %v1759_v5 = vor.u32 %v2084_v3, %v1756_v4  ;;  %v1748_v7 = vld [vmem:[%s2746_s4 + $0x8] sm:$0xf0]  ;;  %v2150_v8 = vld [vmem:[%s2745_s3] ss:$0 sm:$0xff] }
  0x53   :  { %639 = vmatpush.bf16.msra.mxu0 %v2027_v16  ;;  %v1751_v10 = vor.u32 %v2082_v6, %v1748_v7 }
  0x54   :  { %652 = vmatpush.bf16.msra.mxu1 %v2035_v17 }
  0x55   :  { %665 = vmatpush.bf16.msra.mxu2 %v2043_v18 }
  0x56   :  { %678 = vmatpush.bf16.msra.mxu3 %v2051_v26 }
  0x57   :  { %640 = vmatpush.bf16.msra.mxu0 %v2026_v20 }
  0x58   :  { %653 = vmatpush.bf16.msra.mxu1 %v2034_v21 }
  0x59   :  { %666 = vmatpush.bf16.msra.mxu2 %v2042_v22 }
  0x5a   :  { %641 = vmatmul.bf16.vlgmr.msra.gmra.mxu0 %v283_v27  ;;  %679 = vmatpush.bf16.msra.mxu3 %v2050_v33  ;;  %v2088_v33 = vld [vmem:[%s2748_s6 + $0x10] sm:$0xff] }
  0x5b   :  { %685 = vmatpush.bf16.msrb.mxu0 %v2065_v23  ;;  %654 = vmatmul.bf16.vlgmr.msra.gmra.mxu1 %v284_v30  ;;  %v2091_v30 = vld [vmem:[%s2748_s6 + $0x28] sm:$0xff] }
  0x5c   :  { %698 = vmatpush.bf16.msrb.mxu1 %v2073_v24  ;;  %667 = vmatmul.bf16.vlgmr.msra.gmra.mxu2 %v285_v29  ;;  %v2092_v29 = vld [vmem:[%s2748_s6 + $0x30] sm:$0xff] }
  0x5d   :  { %711 = vmatpush.bf16.msrb.mxu2 %v2081_v25  ;;  %680 = vmatmul.bf16.vlgmr.msra.gmra.mxu3 %v286_v37 }
  0x5e   :  { %766 = vmatpush.bf16.msrb.mxu3 %v1755_v58 }
  0x5f   :  { %686 = vmatpush.bf16.msrb.mxu0 %v2064_v28  ;;  %v2093_v28 = vld [vmem:[%s2748_s6 + $0x38] sm:$0xff] }
  0x60   :  { %699 = vmatpush.bf16.msrb.mxu1 %v2072_v31  ;;  %v2090_v31 = vld [vmem:[%s2748_s6 + $0x20] sm:$0xff] }
  0x61   :  { %712 = vmatpush.bf16.msrb.mxu2 %v2080_v32  ;;  %v2089_v32 = vld [vmem:[%s2748_s6 + $0x18] sm:$0xff] }
  0x62   :  { %767 = vmatpush.bf16.msrb.mxu3 %v1747_v63 }
  0x63   :  { %687 = vmatpush.bf16.msrb.mxu0 %v2063_v34  ;;  %v2087_v34 = vld [vmem:[%s2748_s6 + $0x8] sm:$0xff] }
  0x64   :  { %700 = vmatpush.bf16.msrb.mxu1 %v2071_v35  ;;  %v2086_v35 = vld [vmem:[%s2748_s6] sm:$0xff] }
  0x65   :  { %713 = vmatpush.bf16.msrb.mxu2 %v2079_v36 }
  0x66   :  { %779 = vmatpush.bf16.msra.mxu3 %v1759_v5 }
  0x67   :  { %688 = vmatpush.bf16.msrb.mxu0 %v2062_v38  ;;  %v730_v38 = vld [vmem:[%s2747_s5] sm:$0x3] }
  0x68   :  { %701 = vmatpush.bf16.msrb.mxu1 %v2070_v39  ;;  %v733_v39 = vperm.slane %v730_v38, 1 }
  0x69   :  { %714 = vmatpush.bf16.msrb.mxu2 %v2078_v40 }
  0x6a   :  { %780 = vmatpush.bf16.msra.mxu3 %v1751_v10 }
  0x6b   :  { %689 = vmatpush.bf16.msrb.mxu0 %v2061_v41 }
  0x6c   :  { %702 = vmatpush.bf16.msrb.mxu1 %v2069_v42 }
  0x6d   :  { %715 = vmatpush.bf16.msrb.mxu2 %v2077_v43 }
  0x6f   :  { %690 = vmatpush.bf16.msrb.mxu0 %v2060_v44 }
  0x70   :  { %703 = vmatpush.bf16.msrb.mxu1 %v2068_v45  ;;  %v732_v45 = vperm.slane %v730_v38, 0 }
  0x71   :  { %716 = vmatpush.bf16.msrb.mxu2 %v2076_v46  ;;  %v786_v46 = vld [vmem:[%s2743_s1] sm:$0x3] }
  0x73   :  { %691 = vmatpush.bf16.msrb.mxu0 %v2059_v47 }
  0x74   :  { %704 = vmatpush.bf16.msrb.mxu1 %v2067_v48 }
  0x75   :  { %717 = vmatpush.bf16.msrb.mxu2 %v2075_v49 }
  0x77   :  { %692 = vmatpush.bf16.msrb.mxu0 %v2058_v50 }
  0x78   :  { %705 = vmatpush.bf16.msrb.mxu1 %v2066_v51 }
  0x79   :  { %718 = vmatpush.bf16.msrb.mxu2 %v2074_v52  ;;  %v2151_v52 = vld [vmem:[%s2749_s7] ss:$0 sm:$0xff] }
  0x7a   :  { %693 = vmatmul.bf16.vlgmr.msrb.gmra.mxu0 %v287_v53 }
  0x7b   :  { %706 = vmatmul.bf16.vlgmr.msrb.gmra.mxu1 %v288_v54  ;;  %861 = vmatpush.bf16.msra.mxu0 %v2093_v28 }
  0x7c   :  { %719 = vmatmul.bf16.vlgmr.msrb.gmra.mxu2 %v289_v55 }
  0x7f   :  { %862 = vmatpush.bf16.msra.mxu0 %v2092_v29 }
  0x83   :  { %863 = vmatpush.bf16.msra.mxu0 %v2091_v30 }
  0x87   :  { %864 = vmatpush.bf16.msra.mxu0 %v2090_v31 }
  0x8b   :  { %865 = vmatpush.bf16.msra.mxu0 %v2089_v32 }
  0x8f   :  { %866 = vmatpush.bf16.msra.mxu0 %v2088_v33 }
  0x93   :  { %867 = vmatpush.bf16.msra.mxu0 %v2087_v34 }
  0x97   :  { %868 = vmatpush.bf16.msra.mxu0 %v2086_v35 }
  0xd7   :  { %v642_v59 = vpop.f32.mrf.mxu0 }
  0xd8   :  { %v655_v62 = vpop.f32.mrf.mxu1  ;;  %v643_v12 = vadd.f32 %v2150_v8, %v642_v59 }
  0xda   :  { %v656_v13 = vadd.f32 %v655_v62, %v643_v12 }
  0xdf   :  { %v668_v0 = vpop.f32.mrf.mxu2  ;;  %v644_v1 = vpop.f32.mrf.mxu0 }
  0xe0   :  { %v657_v2 = vpop.f32.mrf.mxu1  ;;  %v681_v9 = vpop.f32.mrf.mxu3  ;;  %v669_v15 = vadd.f32 %v668_v0, %v656_v13 }
  0xe2   :  { %v682_v16 = vadd.f32 %v681_v9, %v669_v15 }
  0xe7   :  { %v670_v11 = vpop.f32.mrf.mxu2 }
  0xe8   :  { %v683_v14 = vpop.f32.mrf.mxu3 }
  0xf7   :  { %v694_v17 = vpop.f32.mrf.mxu0 }
  0xf8   :  { %v707_v18 = vpop.f32.mrf.mxu1  ;;  %v695_v19 = vadd.f32 %v694_v17, %v682_v16 }
  0xfa   :  { %v708_v20 = vadd.f32 %v707_v18, %v695_v19 }
  0xff   :  { %v720_v21 = vpop.f32.mrf.mxu2  ;;  %v696_v23 = vpop.f32.mrf.mxu0 }
 0x100   :  { %v721_v22 = vadd.f32 %v720_v21, %v708_v20  ;;  %v709_v24 = vpop.f32.mrf.mxu1 }
 0x102   :  { %v724_v25 = vmax.f32 %v721_v22, 0.0 }
 0x104   :  { %v725_v26 = vpack.c.bf16 %v724_v25, %v724_v25 }
 0x106   :  { %1760 = vmatmul.msk.bf16.vlgmr.msrb.gmra.mxu3 %vm756_vm0, %v725_v26 }
 0x107   :  { %v722_v27 = vpop.f32.mrf.mxu2 }
 0x116   :  { %1761 = vmatmul.msk.bf16.vlgmr.msra.gmra.mxu3 %vm756_vm0, %v725_v26 }
 0x189   :  { %v769_v36 = vpop.f32.mrf.mxu3 }
 0x18a   :  { %v2643_v48 = vadd.f32 %v769_v36, %v732_v45 }
 0x191   :  { %v771_v37 = vpop.f32.mrf.mxu3 }
 0x199   :  { %v782_v40 = vpop.f32.mrf.mxu3 }
 0x19a   :  { %v2637_v41 = vadd.f32 %v782_v40, %v733_v39 }
 0x19c   :  { %v787_v42 = vmul.f32 0.5, %v2637_v41 }
 0x19e   :  { %v788_v43 = vmul.f32 1.442695, %v787_v42 }
 0x1a0   :  { %2152 = vpow2.f32 %v788_v43 }
 0x1a1   :  { %v784_v44 = vpop.f32.mrf.mxu3 }
 0x1a6   :  { %v2153_v47 = vpop.eup %2152 }
 0x1a7   :  { %v790_v49 = vmul.f32 %v2153_v47, %v786_v46 }
 0x1a9   :  { %v791_v50 = vadd.f32 %v790_v49, %v2643_v48 }
 0x1ab   :  { %v792_v51 = vpack.c.bf16 %v791_v50, %v791_v50 }
 0x1ad   :  { %869 = vmatmul.bf16.vlgmr.msra.gmra.mxu0 %v792_v51 }
 0x22a   :  { %v870_v53 = vpop.f32.mrf.mxu0 }
 0x22b   :  { %v2649_v54 = vadd.f32 %v2151_v52, %v870_v53 }
 0x22d   :  { %v874_v55 = vmax.f32 %v2649_v54, 0.0 }
 0x232   :  { %v872_v56 = vpop.f32.mrf.mxu0 }
 0x233   :  { %2182 = dma.done.wait [#allocation3], 7168 }
 0x234   :  { %2183 = vsyncadd [#allocation3], 4294960128  ;;  %v1992_v57 = vld [vmem:[#allocation2 + $0x188] sm:$0xf]  ;;  %v2146_v58 = vld [vmem:[#allocation2 + $0x1a0] sm:$0xf0] }
 0x235   :  { %v2143_v59 = vld [vmem:[#allocation2 + $0x18c] sm:$0xf]  ;;  %v1993_v60 = vor.u32 %v2146_v58, %v1992_v57  ;;  %v1994_v61 = vld [vmem:[#allocation2 + $0x1a4] sm:$0xf0]  ;;  %v2000_v62 = vld [vmem:[#allocation2 + $0x190] sm:$0xf] }
 0x236   :  { %v2147_v63 = vld [vmem:[#allocation2 + $0x1a8] sm:$0xf0]  ;;  %v1997_v0 = vor.u32 %v2143_v59, %v1994_v61  ;;  %v1964_v2 = vld [vmem:[#allocation2 + $0x150] sm:$0xf]  ;;  %v2136_v4 = vld [vmem:[#allocation2 + $0x154] sm:$0xf] }
 0x237   :  { %v2001_v1 = vor.u32 %v2147_v63, %v2000_v62  ;;  %v2139_v3 = vld [vmem:[#allocation2 + $0x168] sm:$0xf0]  ;;  %1248 = vmatpush.bf16.msra.mxu1 %v1993_v60  ;;  %v1966_v6 = vld [vmem:[#allocation2 + $0x16c] sm:$0xf0]  ;;  %v1972_v7 = vld [vmem:[#allocation2 + $0x158] sm:$0xf] }
 0x238   :  { %v1965_v5 = vor.u32 %v2139_v3, %v1964_v2  ;;  %v2140_v8 = vld [vmem:[#allocation2 + $0x170] sm:$0xf0]  ;;  %1261 = vmatpush.bf16.msra.mxu2 %v1997_v0  ;;  %v1969_v9 = vor.u32 %v2136_v4, %v1966_v6  ;;  %v2002_v12 = vld [vmem:[#allocation2 + $0x1ac] sm:$0xf0]  ;;  %v1936_v13 = vld [vmem:[#allocation2 + $0x118] sm:$0xf] }
 0x239   :  { %1274 = vmatpush.bf16.msrb.mxu3 %v2001_v1  ;;  %v1973_v10 = vor.u32 %v2140_v8, %v1972_v7  ;;  %v2144_v11 = vld [vmem:[#allocation2 + $0x194] sm:$0xf]  ;;  %v2129_v16 = vld [vmem:[#allocation2 + $0x11c] sm:$0xf]  ;;  %v1938_v17 = vld [vmem:[#allocation2 + $0x134] sm:$0xf0] }
 0x23a   :  { %v2005_v14 = vor.u32 %v2144_v11, %v2002_v12  ;;  %v2132_v15 = vld [vmem:[#allocation2 + $0x130] sm:$0xf0]  ;;  %v1944_v18 = vld [vmem:[#allocation2 + $0x120] sm:$0xf]  ;;  %v2133_v19 = vld [vmem:[#allocation2 + $0x138] sm:$0xf0]  ;;  %v1941_v25 = vor.u32 %v2129_v16, %v1938_v17 }
 0x23b   :  { %v2137_v20 = vld [vmem:[#allocation2 + $0x15c] sm:$0xf]  ;;  %1249 = vmatpush.bf16.msra.mxu1 %v1965_v5  ;;  %v1937_v21 = vor.u32 %v2132_v15, %v1936_v13  ;;  %v1974_v22 = vld [vmem:[#allocation2 + $0x174] sm:$0xf0]  ;;  %v1908_v23 = vld [vmem:[#allocation2 + $0xe0] sm:$0xf]  ;;  %v1945_v26 = vor.u32 %v2133_v19, %v1944_v18 }
 0x23c   :  { %1287 = vmatpush.bf16.msrb.mxu0 %v2005_v14  ;;  %v2125_v24 = vld [vmem:[#allocation2 + $0xf8] sm:$0xf0]  ;;  %1262 = vmatpush.bf16.msra.mxu2 %v1969_v9  ;;  %v1977_v27 = vor.u32 %v2137_v20, %v1974_v22  ;;  %v2122_v28 = vld [vmem:[#allocation2 + $0xe4] sm:$0xf]  ;;  %v1910_v29 = vld [vmem:[#allocation2 + $0xfc] sm:$0xf0] }
 0x23d   :  { %1275 = vmatpush.bf16.msrb.mxu3 %v1973_v10  ;;  %v1916_v30 = vld [vmem:[#allocation2 + $0xe8] sm:$0xf]  ;;  %v2126_v31 = vld [vmem:[#allocation2 + $0x100] sm:$0xf0]  ;;  %v1946_v33 = vld [vmem:[#allocation2 + $0x13c] sm:$0xf0]  ;;  %v1909_v34 = vor.u32 %v2125_v24, %v1908_v23  ;;  %v1913_v38 = vor.u32 %v2122_v28, %v1910_v29 }
 0x23e   :  { %v2130_v32 = vld [vmem:[#allocation2 + $0x124] sm:$0xf]  ;;  %v1880_v36 = vld [vmem:[#allocation2 + $0xa8] sm:$0xf]  ;;  %v1917_v39 = vor.u32 %v2126_v31, %v1916_v30  ;;  %v2115_v40 = vld [vmem:[#allocation2 + $0xac] sm:$0xf] }
 0x23f   :  { %1250 = vmatpush.bf16.msra.mxu1 %v1937_v21  ;;  %v1949_v35 = vor.u32 %v2130_v32, %v1946_v33  ;;  %v2118_v37 = vld [vmem:[#allocation2 + $0xc0] sm:$0xf0]  ;;  %v2123_v42 = vld [vmem:[#allocation2 + $0xec] sm:$0xf]  ;;  %v1918_v43 = vld [vmem:[#allocation2 + $0x104] sm:$0xf0] }
 0x240   :  { %1288 = vmatpush.bf16.msrb.mxu0 %v1977_v27  ;;  %1263 = vmatpush.bf16.msra.mxu2 %v1941_v25  ;;  %v1882_v44 = vld [vmem:[#allocation2 + $0xc4] sm:$0xf0]  ;;  %v1888_v45 = vld [vmem:[#allocation2 + $0xb0] sm:$0xf]  ;;  %v2119_v46 = vld [vmem:[#allocation2 + $0xc8] sm:$0xf0]  ;;  %v1881_v47 = vor.u32 %v2118_v37, %v1880_v36  ;;  %v1921_v49 = vor.u32 %v2123_v42, %v1918_v43  ;;  %v2655_v42 = vpack.c.bf16 %v874_v55, %v874_v55 }
 0x241   :  { %1276 = vmatpush.bf16.msrb.mxu3 %v1945_v26  ;;  %v1852_v50 = vld [vmem:[#allocation2 + $0x70] sm:$0xf]  ;;  %v2111_v51 = vld [vmem:[#allocation2 + $0x88] sm:$0xf0]  ;;  %v1885_v52 = vor.u32 %v2115_v40, %v1882_v44  ;;  %v1889_v53 = vor.u32 %v2119_v46, %v1888_v45  ;;  %v2108_v56 = vld [vmem:[#allocation2 + $0x74] sm:$0xf] }
 0x242   :  { %v2116_v57 = vld [vmem:[#allocation2 + $0xb4] sm:$0xf]  ;;  %v1890_v58 = vld [vmem:[#allocation2 + $0xcc] sm:$0xf0]  ;;  %v1860_v60 = vld [vmem:[#allocation2 + $0x78] sm:$0xf]  ;;  %v1853_v62 = vor.u32 %v2111_v51, %v1852_v50 }
 0x243   :  { %1251 = vmatpush.bf16.msra.mxu1 %v1909_v34  ;;  %v1854_v59 = vld [vmem:[#allocation2 + $0x8c] sm:$0xf0]  ;;  %v2112_v61 = vld [vmem:[#allocation2 + $0x90] sm:$0xf0]  ;;  %v1893_v63 = vor.u32 %v2116_v57, %v1890_v58  ;;  %v1824_v0 = vld [vmem:[#allocation2 + $0x38] sm:$0xf] }
 0x244   :  { %1289 = vmatpush.bf16.msrb.mxu0 %v1949_v35  ;;  %1264 = vmatpush.bf16.msra.mxu2 %v1913_v38  ;;  %v2104_v1 = vld [vmem:[#allocation2 + $0x50] sm:$0xf0]  ;;  %v1857_v2 = vor.u32 %v2108_v56, %v1854_v59  ;;  %v1861_v3 = vor.u32 %v2112_v61, %v1860_v60  ;;  %v2101_v4 = vld [vmem:[#allocation2 + $0x3c] sm:$0xf]  ;;  %v1862_v6 = vld [vmem:[#allocation2 + $0x94] sm:$0xf0] }
 0x245   :  { %1277 = vmatpush.bf16.msrb.mxu3 %v1917_v39  ;;  %v2109_v5 = vld [vmem:[#allocation2 + $0x7c] sm:$0xf]  ;;  %v1826_v7 = vld [vmem:[#allocation2 + $0x54] sm:$0xf0]  ;;  %v1832_v8 = vld [vmem:[#allocation2 + $0x40] sm:$0xf]  ;;  %v1825_v10 = vor.u32 %v2104_v1, %v1824_v0 }
 0x246   :  { %v2105_v9 = vld [vmem:[#allocation2 + $0x58] sm:$0xf0]  ;;  %v1865_v11 = vor.u32 %v2109_v5, %v1862_v6  ;;  %v1796_v12 = vld [vmem:[#allocation2] sm:$0xf]  ;;  %v2094_v14 = vld [vmem:[#allocation2 + $0x4] sm:$0xf]  ;;  %v1829_v15 = vor.u32 %v2101_v4, %v1826_v7 }
 0x247   :  { %1252 = vmatpush.bf16.msra.mxu1 %v1881_v47  ;;  %v2097_v13 = vld [vmem:[#allocation2 + $0x18] sm:$0xf0]  ;;  %v1833_v16 = vor.u32 %v2105_v9, %v1832_v8  ;;  %v1798_v17 = vld [vmem:[#allocation2 + $0x1c] sm:$0xf0]  ;;  %v2102_v18 = vld [vmem:[#allocation2 + $0x44] sm:$0xf] }
 0x248   :  { %1290 = vmatpush.bf16.msrb.mxu0 %v1921_v49  ;;  %1265 = vmatpush.bf16.msra.mxu2 %v1885_v52  ;;  %v1834_v19 = vld [vmem:[#allocation2 + $0x5c] sm:$0xf0]  ;;  %v1804_v20 = vld [vmem:[#allocation2 + $0x8] sm:$0xf]  ;;  %v2098_v21 = vld [vmem:[#allocation2 + $0x20] sm:$0xf0]  ;;  %v1797_v26 = vor.u32 %v2097_v13, %v1796_v12  ;;  %v1801_v30 = vor.u32 %v2094_v14, %v1798_v17 }
 0x249   :  { %1278 = vmatpush.bf16.msrb.mxu3 %v1889_v53  ;;  %v2008_v22 = vld [vmem:[#allocation2 + $0x198] sm:$0xf]  ;;  %v2148_v23 = vld [vmem:[#allocation2 + $0x1b0] sm:$0xf0]  ;;  %v2145_v24 = vld [vmem:[#allocation2 + $0x19c] sm:$0xf]  ;;  %v1837_v29 = vor.u32 %v2102_v18, %v1834_v19  ;;  %v1805_v31 = vor.u32 %v2098_v21, %v1804_v20 }
 0x24a   :  { %v2010_v25 = vld [vmem:[#allocation2 + $0x1b4] sm:$0xf0]  ;;  %v2016_v27 = vld [vmem:[#allocation2 + $0x1a0] sm:$0xf]  ;;  %v2149_v28 = vld [vmem:[#allocation2 + $0x1b8] sm:$0xf0]  ;;  %v2009_v32 = vor.u32 %v2148_v23, %v2008_v22 }
 0x24b   :  { %1253 = vmatpush.bf16.msra.mxu1 %v1853_v62  ;;  %v2013_v33 = vor.u32 %v2145_v24, %v2010_v25  ;;  %v1980_v34 = vld [vmem:[#allocation2 + $0x160] sm:$0xf]  ;;  %v2095_v35 = vld [vmem:[#allocation2 + $0xc] sm:$0xf]  ;;  %v1806_v36 = vld [vmem:[#allocation2 + $0x24] sm:$0xf0]  ;;  %v2017_v37 = vor.u32 %v2149_v28, %v2016_v27 }
 0x24c   :  { %1291 = vmatpush.bf16.msrb.mxu0 %v1893_v63  ;;  %1266 = vmatpush.bf16.msra.mxu2 %v1857_v2  ;;  %v2141_v38 = vld [vmem:[#allocation2 + $0x178] sm:$0xf0]  ;;  %v2138_v39 = vld [vmem:[#allocation2 + $0x164] sm:$0xf]  ;;  %v1982_v40 = vld [vmem:[#allocation2 + $0x17c] sm:$0xf0]  ;;  %v1809_v45 = vor.u32 %v2095_v35, %v1806_v36 }
 0x24d   :  { %1279 = vmatpush.bf16.msrb.mxu3 %v1861_v3  ;;  %v1988_v43 = vld [vmem:[#allocation2 + $0x168] sm:$0xf]  ;;  %v2142_v44 = vld [vmem:[#allocation2 + $0x180] sm:$0xf0]  ;;  %v1981_v46 = vor.u32 %v2141_v38, %v1980_v34  ;;  %v1985_v47 = vor.u32 %v2138_v39, %v1982_v40  ;;  %v2131_v52 = vld [vmem:[#allocation2 + $0x12c] sm:$0xf] }
 0x24e   :  { %v1952_v49 = vld [vmem:[#allocation2 + $0x128] sm:$0xf]  ;;  %v1989_v50 = vor.u32 %v2142_v44, %v1988_v43  ;;  %v2134_v51 = vld [vmem:[#allocation2 + $0x140] sm:$0xf0]  ;;  %v1960_v54 = vld [vmem:[#allocation2 + $0x130] sm:$0xf] }
 0x24f   :  { %1254 = vmatpush.bf16.msra.mxu1 %v1825_v10  ;;  %v1954_v53 = vld [vmem:[#allocation2 + $0x144] sm:$0xf0]  ;;  %v2135_v55 = vld [vmem:[#allocation2 + $0x148] sm:$0xf0]  ;;  %v1953_v56 = vor.u32 %v2134_v51, %v1952_v49  ;;  %v1924_v58 = vld [vmem:[#allocation2 + $0xf0] sm:$0xf] }
 0x250   :  { %1292 = vmatpush.bf16.msrb.mxu0 %v1865_v11  ;;  %1267 = vmatpush.bf16.msra.mxu2 %v1829_v15  ;;  %v1957_v57 = vor.u32 %v2131_v52, %v1954_v53  ;;  %v1961_v59 = vor.u32 %v2135_v55, %v1960_v54  ;;  %v2127_v60 = vld [vmem:[#allocation2 + $0x108] sm:$0xf0]  ;;  %v2124_v61 = vld [vmem:[#allocation2 + $0xf4] sm:$0xf]  ;;  %v1926_v62 = vld [vmem:[#allocation2 + $0x10c] sm:$0xf0] }
 0x251   :  { %1280 = vmatpush.bf16.msrb.mxu3 %v1833_v16  ;;  %v1932_v63 = vld [vmem:[#allocation2 + $0xf8] sm:$0xf]  ;;  %v2128_v0 = vld [vmem:[#allocation2 + $0x110] sm:$0xf0]  ;;  %v1925_v1 = vor.u32 %v2127_v60, %v1924_v58  ;;  %v1929_v2 = vor.u32 %v2124_v61, %v1926_v62  ;;  %v2117_v6 = vld [vmem:[#allocation2 + $0xbc] sm:$0xf] }
 0x252   :  { %v1896_v3 = vld [vmem:[#allocation2 + $0xb8] sm:$0xf]  ;;  %v1933_v4 = vor.u32 %v2128_v0, %v1932_v63  ;;  %v2120_v5 = vld [vmem:[#allocation2 + $0xd0] sm:$0xf0]  ;;  %v1904_v8 = vld [vmem:[#allocation2 + $0xc0] sm:$0xf] }
 0x253   :  { %1255 = vmatpush.bf16.msra.mxu1 %v1797_v26  ;;  %v1898_v7 = vld [vmem:[#allocation2 + $0xd4] sm:$0xf0]  ;;  %v2121_v9 = vld [vmem:[#allocation2 + $0xd8] sm:$0xf0]  ;;  %v1897_v10 = vor.u32 %v2120_v5, %v1896_v3  ;;  %v1868_v12 = vld [vmem:[#allocation2 + $0x80] sm:$0xf] }
 0x254   :  { %1293 = vmatpush.bf16.msrb.mxu0 %v1837_v29  ;;  %1268 = vmatpush.bf16.msra.mxu2 %v1801_v30  ;;  %v1901_v11 = vor.u32 %v2117_v6, %v1898_v7  ;;  %v1905_v13 = vor.u32 %v2121_v9, %v1904_v8  ;;  %v2113_v14 = vld [vmem:[#allocation2 + $0x98] sm:$0xf0]  ;;  %v2110_v15 = vld [vmem:[#allocation2 + $0x84] sm:$0xf]  ;;  %v1870_v16 = vld [vmem:[#allocation2 + $0x9c] sm:$0xf0] }
 0x255   :  { %1281 = vmatpush.bf16.msrb.mxu3 %v1805_v31  ;;  %v1876_v17 = vld [vmem:[#allocation2 + $0x88] sm:$0xf]  ;;  %v2114_v18 = vld [vmem:[#allocation2 + $0xa0] sm:$0xf0]  ;;  %v1869_v19 = vor.u32 %v2113_v14, %v1868_v12  ;;  %v1873_v20 = vor.u32 %v2110_v15, %v1870_v16  ;;  %v2103_v24 = vld [vmem:[#allocation2 + $0x4c] sm:$0xf] }
 0x256   :  { %1256 = vmatmul.bf16.vlgmr.msra.gmra.mxu1 %v2655_v42  ;;  %v1840_v21 = vld [vmem:[#allocation2 + $0x48] sm:$0xf]  ;;  %v1877_v22 = vor.u32 %v2114_v18, %v1876_v17  ;;  %v2106_v23 = vld [vmem:[#allocation2 + $0x60] sm:$0xf0]  ;;  %v1848_v26 = vld [vmem:[#allocation2 + $0x50] sm:$0xf] }
 0x257   :  { %1300 = vmatpush.bf16.msrb.mxu1 %v2009_v32  ;;  %1269 = vmatmul.bf16.vlgmr.msra.gmra.mxu2 %v2655_v42  ;;  %v1842_v25 = vld [vmem:[#allocation2 + $0x64] sm:$0xf0]  ;;  %v2107_v27 = vld [vmem:[#allocation2 + $0x68] sm:$0xf0]  ;;  %v1841_v28 = vor.u32 %v2106_v23, %v1840_v21  ;;  %v1812_v30 = vld [vmem:[#allocation2 + $0x10] sm:$0xf] }
 0x258   :  { %1313 = vmatpush.bf16.msrb.mxu2 %v2013_v33  ;;  %1282 = vmatmul.bf16.vlgmr.msrb.gmra.mxu3 %v2655_v42  ;;  %v1845_v29 = vor.u32 %v2103_v24, %v1842_v25  ;;  %v1849_v31 = vor.u32 %v2107_v27, %v1848_v26  ;;  %v2099_v32 = vld [vmem:[#allocation2 + $0x28] sm:$0xf0]  ;;  %v2096_v33 = vld [vmem:[#allocation2 + $0x14] sm:$0xf]  ;;  %v1814_v34 = vld [vmem:[#allocation2 + $0x2c] sm:$0xf0] }
 0x259   :  { %1326 = vmatpush.bf16.msra.mxu3 %v2017_v37  ;;  %1294 = vmatpush.bf16.msrb.mxu0 %v1809_v45  ;;  %v1820_v35 = vld [vmem:[#allocation2 + $0x18] sm:$0xf]  ;;  %v2100_v36 = vld [vmem:[#allocation2 + $0x30] sm:$0xf0]  ;;  %v1813_v37 = vor.u32 %v2099_v32, %v1812_v30  ;;  %v1817_v38 = vor.u32 %v2096_v33, %v1814_v34  ;;  %v1498_v61 = vrot.slane %v2637_v41, 6  ;;  %vm1484_vm1 = vcmask 1041408  }
 0x25a   :  { %v1821_v39 = vor.u32 %v2100_v36, %v1820_v35  ;;  %v2667_v40 = vld [vmem:[%s2751_s9] sm:$0xff] }
 0x25b   :  { %1301 = vmatpush.bf16.msrb.mxu1 %v1981_v46  ;;  %v946_v43 = vperm.slane %v2667_v40, 0  ;;  %v949_v46 = vperm.slane %v2667_v40, 3  ;;  %v947_v49 = vperm.slane %v2667_v40, 1  ;;  %v1499_v63 = vsel %vm1484_vm1, %v2643_v48, %v1498_v61 }
 0x25c   :  { %1314 = vmatpush.bf16.msrb.mxu2 %v1985_v47  ;;  %1295 = vmatmul.bf16.vlgmr.msrb.gmra.mxu0 %v2655_v42  ;;  %1501 = vst [vmem:[%s2753_s11] sm:$0xf] %v1499_v63  ;;  %v952_v12 = vperm.slane %v2667_v40, 6 }
 0x25d   :  { %1327 = vmatpush.bf16.msra.mxu3 %v1989_v50  ;;  %v948_v50 = vperm.slane %v2667_v40, 2 }
 0x25f   :  { %1302 = vmatpush.bf16.msrb.mxu1 %v1953_v56 }
 0x260   :  { %1315 = vmatpush.bf16.msrb.mxu2 %v1957_v57 }
 0x261   :  { %1328 = vmatpush.bf16.msra.mxu3 %v1961_v59 }
 0x263   :  { %1303 = vmatpush.bf16.msrb.mxu1 %v1925_v1 }
 0x264   :  { %1316 = vmatpush.bf16.msrb.mxu2 %v1929_v2 }
 0x265   :  { %1329 = vmatpush.bf16.msra.mxu3 %v1933_v4 }
 0x267   :  { %1304 = vmatpush.bf16.msrb.mxu1 %v1897_v10  ;;  %v950_v10 = vperm.slane %v2667_v40, 4 }
 0x268   :  { %1317 = vmatpush.bf16.msrb.mxu2 %v1901_v11  ;;  %v951_v11 = vperm.slane %v2667_v40, 5 }
 0x269   :  { %1330 = vmatpush.bf16.msra.mxu3 %v1905_v13 }
 0x26b   :  { %1305 = vmatpush.bf16.msrb.mxu1 %v1869_v19 }
 0x26c   :  { %1318 = vmatpush.bf16.msrb.mxu2 %v1873_v20 }
 0x26d   :  { %1331 = vmatpush.bf16.msra.mxu3 %v1877_v22 }
 0x26f   :  { %1306 = vmatpush.bf16.msrb.mxu1 %v1841_v28 }
 0x270   :  { %1319 = vmatpush.bf16.msrb.mxu2 %v1845_v29 }
 0x271   :  { %1332 = vmatpush.bf16.msra.mxu3 %v1849_v31 }
 0x273   :  { %1307 = vmatpush.bf16.msrb.mxu1 %v1813_v37 }
 0x274   :  { %1320 = vmatpush.bf16.msrb.mxu2 %v1817_v38 }
 0x275   :  { %1333 = vmatpush.bf16.msra.mxu3 %v1821_v39 }
 0x276   :  { %1308 = vmatmul.bf16.vlgmr.msrb.gmra.mxu1 %v2655_v42 }
 0x277   :  { %1321 = vmatmul.bf16.vlgmr.msrb.gmra.mxu2 %v2655_v42 }
 0x278   :  { %1334 = vmatmul.bf16.vlgmr.msra.gmra.mxu3 %v2655_v42 }
 0x2d3   :  { %v1257_v44 = vpop.f32.mrf.mxu1 }
 0x2d4   :  { %v1258_v45 = vadd.f32 %v1257_v44, %v946_v43 }
 0x2d6   :  { %v2018_v47 = vmul.f32 -1.442695, %v1258_v45 }
 0x2d8   :  { %2154 = vpow2.f32 %v2018_v47 }
 0x2d9   :  { %v1296_v51 = vpop.f32.mrf.mxu0 }
 0x2da   :  { %v1297_v52 = vadd.f32 %v1296_v51, %v949_v46  ;;  %v1270_v42 = vpop.f32.mrf.mxu2 }
 0x2db   :  { %v1283_v53 = vpop.f32.mrf.mxu3  ;;  %v1271_v54 = vadd.f32 %v1270_v42, %v947_v49  ;;  %v1259_v57 = vpop.f32.mrf.mxu1 }
 0x2dc   :  { %v1284_v55 = vadd.f32 %v1283_v53, %v948_v50  ;;  %v2021_v56 = vmul.f32 -1.442695, %v1297_v52 }
 0x2dd   :  { %v2019_v58 = vmul.f32 -1.442695, %v1271_v54 }
 0x2de   :  { %v2020_v59 = vmul.f32 -1.442695, %v1284_v55  ;;  %2156 = vpow2.f32 %v2021_v56  ;;  %v2155_v60 = vpop.eup %2154 }
 0x2df   :  { %2158 = vpow2.f32 %v2019_v58  ;;  %v1360_v62 = vadd.f32 1.0, %v2155_v60 }
 0x2e0   :  { %2160 = vpow2.f32 %v2020_v59 }
 0x2e1   :  { %v1298_v0 = vpop.f32.mrf.mxu0  ;;  %2162 = vrcp.f32 %v1360_v62  ;;  %v1376_v9 = vand.u32 2147483647, %v1360_v62  ;;  %vm1372_vm3 = vweird.f32 %v1360_v62  ;;  %v1378_v15 = vand.u32 2147483648, %v1360_v62 }
 0x2e2   :  { %v1272_v1 = vpop.f32.mrf.mxu2 }
 0x2e3   :  { %v1285_v2 = vpop.f32.mrf.mxu3  ;;  %vm2685_vm4 = vcmp.eq.f32.partialorder %v1376_v9, 8.507059e+37  ;;  %v1379_v44 = vor.u32 1.1754944e-38, %v1378_v15 }
 0x2e4   :  { %v2157_v3 = vpop.eup %2156 }
 0x2e5   :  { %v1363_v4 = vadd.f32 1.0, %v2157_v3  ;;  %v2159_v5 = vpop.eup %2158 }
 0x2e6   :  { %v2161_v6 = vpop.eup %2160  ;;  %v1361_v41 = vadd.f32 1.0, %v2159_v5 }
 0x2e7   :  { %2164 = vrcp.f32 %v1363_v4  ;;  %v1362_v7 = vadd.f32 1.0, %v2161_v6  ;;  %v2679_v8 = vpop.eup %2162  ;;  %vm1417_vm2 = vweird.f32 %v1363_v4  ;;  %v1421_v17 = vand.u32 2147483647, %v1363_v4 }
 0x2e8   :  { %2166 = vrcp.f32 %v1361_v41  ;;  %v1368_v48 = vmul.f32 %v2679_v8, %v1360_v62  ;;  %v1423_v18 = vand.u32 2147483648, %v1363_v4  ;;  %vm1387_vm5 = vweird.f32 %v1361_v41 }
 0x2e9   :  { %2168 = vrcp.f32 %v1362_v7  ;;  %v1391_v21 = vand.u32 2147483647, %v1361_v41  ;;  %v1393_v22 = vand.u32 2147483648, %v1361_v41  ;;  %vm1373_vm6 = vweird.f32 %v2679_v8 }
 0x2ea   :  { %v1369_v19 = vsub.f32 1.0, %v1368_v48  ;;  %vm1402_vm8 = vweird.f32 %v1362_v7  ;;  %v1406_v28 = vand.u32 2147483647, %v1362_v7  ;;  %v1408_v29 = vand.u32 2147483648, %v1362_v7  ;;  %vm2693_vm10 = vmor %vm1372_vm3, %vm1373_vm6 }
 0x2eb   :  { %v1424_v37 = vor.u32 1.1754944e-38, %v1423_v18  ;;  %vm1422_vm13 = vcmp.eq.f32.partialorder %v1421_v17, 8.507059e+37  ;;  %v1394_v46 = vor.u32 1.1754944e-38, %v1393_v22  ;;  %vm1392_vm15 = vcmp.eq.f32.partialorder %v1391_v21, 8.507059e+37 }
 0x2ec   :  { %v1370_v26 = vmul.f32 %v2679_v8, %v1369_v19  ;;  %v1409_v42 = vor.u32 1.1754944e-38, %v1408_v29  ;;  %vm1486_vm3 = vcmask 1045508  }
 0x2ed   :  { %v2165_v13 = vpop.eup %2164 }
 0x2ee   :  { %v1413_v16 = vmul.f32 %v2165_v13, %v1363_v4  ;;  %v2167_v20 = vpop.eup %2166  ;;  %vm1418_vm7 = vweird.f32 %v2165_v13  ;;  %v1371_v32 = vadd.f32 %v2679_v8, %v1370_v26 }
 0x2ef   :  { %v2169_v23 = vpop.eup %2168  ;;  %v1383_v24 = vmul.f32 %v2167_v20, %v1361_v41  ;;  %vm1388_vm9 = vweird.f32 %v2167_v20  ;;  %vm2698_vm12 = vmor %vm1417_vm2, %vm1418_vm7  ;;  %vm1407_vm2 = vcmp.eq.f32.partialorder %v1406_v28, 8.507059e+37 }
 0x2f0   :  { %v1414_v25 = vsub.f32 1.0, %v1413_v16  ;;  %v1398_v27 = vmul.f32 %v2169_v23, %v1362_v7  ;;  %vm1403_vm11 = vweird.f32 %v2169_v23  ;;  %vm2703_vm14 = vmor %vm1387_vm5, %vm1388_vm9  ;;  %v1375_v49 = vsel %vm2693_vm10, %v2679_v8, %v1371_v32 }
 0x2f1   :  { %v1384_v30 = vsub.f32 1.0, %v1383_v24  ;;  %vm2712_vm0 = vmor %vm1402_vm8, %vm1403_vm11  ;;  %v1380_v57 = vsel %vm2685_vm4, %v1379_v44, %v1375_v49  ;;  %vm1488_vm5 = vcmask 1043456  }
 0x2f2   :  { %v1415_v31 = vmul.f32 %v2165_v13, %v1414_v25  ;;  %v1399_v35 = vsub.f32 1.0, %v1398_v27 }
 0x2f3   :  { %v1309_v34 = vpop.f32.mrf.mxu1  ;;  %v1385_v39 = vmul.f32 %v2167_v20, %v1384_v30 }
 0x2f4   :  { %v1310_v38 = vadd.f32 %v1309_v34, %v950_v10  ;;  %v1416_v43 = vadd.f32 %v2165_v13, %v1415_v31  ;;  %v1400_v47 = vmul.f32 %v2169_v23, %v1399_v35 }
 0x2f5   :  { %v1386_v51 = vadd.f32 %v2167_v20, %v1385_v39 }
 0x2f6   :  { %v2022_v50 = vmul.f32 -1.442695, %v1310_v38  ;;  %v1420_v53 = vsel %vm2698_vm12, %v2165_v13, %v1416_v43  ;;  %v1401_v54 = vadd.f32 %v2169_v23, %v1400_v47 }
 0x2f7   :  { %v1425_v55 = vsel %vm1422_vm13, %v1424_v37, %v1420_v53  ;;  %v1390_v56 = vsel %vm2703_vm14, %v2167_v20, %v1386_v51 }
 0x2f8   :  { %2170 = vpow2.f32 %v2022_v50  ;;  %v1395_v59 = vsel %vm1392_vm15, %v1394_v46, %v1390_v56  ;;  %v1405_v60 = vsel %vm2712_vm0, %v2169_v23, %v1401_v54  ;;  %v1481_v61 = vrot.slane %v1425_v55, 2 }
 0x2f9   :  { %v1479_v0 = vrot.slane %v1395_v59, 6  ;;  %v1410_v1 = vsel %vm1407_vm2, %v1409_v42, %v1405_v60 }
 0x2fa   :  { %v1322_v58 = vpop.f32.mrf.mxu2  ;;  %v1480_v4 = vrot.slane %v1410_v1, 4 }
 0x2fb   :  { %v1323_v62 = vadd.f32 %v1322_v58, %v951_v11  ;;  %v1335_v63 = vpop.f32.mrf.mxu3  ;;  %v1311_v3 = vpop.f32.mrf.mxu1  ;;  %v1485_v6 = vsel %vm1484_vm1, %v1380_v57, %v1479_v0 }
 0x2fc   :  { %v1336_v2 = vadd.f32 %v1335_v63, %v952_v12  ;;  %v1487_v8 = vsel %vm1486_vm3, %v1480_v4, %v1481_v61 }
 0x2fd   :  { %v2023_v5 = vmul.f32 -1.442695, %v1323_v62  ;;  %v1489_v9 = vsel %vm1488_vm5, %v1485_v6, %v1487_v8 }
 0x2fe   :  { %v2024_v41 = vmul.f32 -1.442695, %v1336_v2  ;;  %v2171_v7 = vpop.eup %2170  ;;  %1494 = vst [vmem:[%s2752_s10] sm:$0xff] %v1489_v9 }
 0x2ff   :  { %2172 = vpow2.f32 %v2023_v5  ;;  %v1364_v48 = vadd.f32 1.0, %v2171_v7 }
 0x300   :  { %2174 = vpow2.f32 %v2024_v41 }
 0x301   :  { %2176 = vrcp.f32 %v1364_v48  ;;  %vm1432_vm4 = vweird.f32 %v1364_v48  ;;  %v1438_v30 = vand.u32 2147483648, %v1364_v48  ;;  %v1436_v34 = vand.u32 2147483647, %v1364_v48 }
 0x302   :  { %v1324_v40 = vpop.f32.mrf.mxu2 }
 0x303   :  { %v1337_v10 = vpop.f32.mrf.mxu3  ;;  %v1439_v44 = vor.u32 1.1754944e-38, %v1438_v30  ;;  %vm1437_vm0 = vcmp.eq.f32.partialorder %v1436_v34, 8.507059e+37 }
 0x305   :  { %v2173_v11 = vpop.eup %2172 }
 0x306   :  { %v2175_v12 = vpop.eup %2174  ;;  %v1365_v13 = vadd.f32 1.0, %v2173_v11 }
 0x307   :  { %v1366_v14 = vadd.f32 1.0, %v2175_v12  ;;  %v2177_v15 = vpop.eup %2176 }
 0x308   :  { %2178 = vrcp.f32 %v1365_v13  ;;  %v1428_v16 = vmul.f32 %v2177_v15, %v1364_v48  ;;  %vm1433_vm6 = vweird.f32 %v2177_v15  ;;  %v1451_v24 = vand.u32 2147483647, %v1365_v13 }
 0x309   :  { %2180 = vrcp.f32 %v1366_v14  ;;  %v1453_v25 = vand.u32 2147483648, %v1365_v13  ;;  %v1468_v29 = vand.u32 2147483648, %v1366_v14  ;;  %v1466_v32 = vand.u32 2147483647, %v1366_v14  ;;  %vm2731_vm9 = vmor %vm1432_vm4, %vm1433_vm6 }
 0x30a   :  { %v1429_v17 = vsub.f32 1.0, %v1428_v16  ;;  %vm1447_vm10 = vweird.f32 %v1365_v13  ;;  %vm1462_vm12 = vweird.f32 %v1366_v14  ;;  %vm1452_vm13 = vcmp.eq.f32.partialorder %v1451_v24, 8.507059e+37 }
 0x30b   :  { %v1454_v36 = vor.u32 1.1754944e-38, %v1453_v25  ;;  %v1469_v43 = vor.u32 1.1754944e-38, %v1468_v29  ;;  %vm1467_vm15 = vcmp.eq.f32.partialorder %v1466_v32, 8.507059e+37 }
 0x30c   :  { %v1430_v20 = vmul.f32 %v2177_v15, %v1429_v17 }
 0x30e   :  { %v2179_v18 = vpop.eup %2178  ;;  %v1431_v27 = vadd.f32 %v2177_v15, %v1430_v20 }
 0x30f   :  { %v2181_v19 = vpop.eup %2180  ;;  %v1443_v21 = vmul.f32 %v2179_v18, %v1365_v13  ;;  %vm1448_vm7 = vweird.f32 %v2179_v18 }
 0x310   :  { %v1458_v22 = vmul.f32 %v2181_v19, %v1366_v14  ;;  %vm1463_vm8 = vweird.f32 %v2181_v19  ;;  %vm1449_vm11 = vmor %vm1447_vm10, %vm1448_vm7  ;;  %v1435_v38 = vsel %vm2731_vm9, %v2177_v15, %v1431_v27 }
 0x311   :  { %v1444_v23 = vsub.f32 1.0, %v1443_v21  ;;  %vm1464_vm14 = vmor %vm1462_vm12, %vm1463_vm8  ;;  %v1440_v50 = vsel %vm1437_vm0, %v1439_v44, %v1435_v38 }
 0x312   :  { %v1459_v26 = vsub.f32 1.0, %v1458_v22 }
 0x313   :  { %v1445_v28 = vmul.f32 %v2179_v18, %v1444_v23 }
 0x314   :  { %v1460_v31 = vmul.f32 %v2181_v19, %v1459_v26 }
 0x315   :  { %v1446_v35 = vadd.f32 %v2179_v18, %v1445_v28 }
 0x316   :  { %v1461_v37 = vadd.f32 %v2181_v19, %v1460_v31 }
 0x317   :  { %v1450_v39 = vsel %vm1449_vm11, %v2179_v18, %v1446_v35 }
 0x318   :  { %v1455_v45 = vsel %vm1452_vm13, %v1454_v36, %v1450_v39  ;;  %v1465_v46 = vsel %vm1464_vm14, %v2181_v19, %v1461_v37 }
 0x319   :  { %v1482_v47 = vrot.slane %v1455_v45, 6  ;;  %v1470_v49 = vsel %vm1467_vm15, %v1469_v43, %v1465_v46 }
 0x31a   :  { %v1483_v51 = vrot.slane %v1470_v49, 4 }
 0x31b   :  { %v1490_v52 = vsel %vm1484_vm1, %v1440_v50, %v1482_v47 }
 0x31c   :  { %v1491_v42 = vsel %vm1488_vm5, %v1490_v52, %v1483_v51 }
 0x31d   :  { %1495 = vst [vmem:[%s2752_s10 + $0x8] sm:$0x3f] %v1491_v42 }
 0x31e   :  { %1510 = vsyncmov [#allocation3] }
 0x321   :  { %s1511_s3 = vpop.sfrf %1510 }
 0x322   :  { %p2025_p0 = scmp.ne.s32.totalorder %s1511_s3, 0 }
 0x324   :  { %1515 = shalt.err (%p2025_p0)  }

</bundles_post_ra>
